<compile_context>
chip_gen: v7x
topology: tpu7x:2x2x1
jax: 0.10.0
libtpu: 0.0.40
codegen_flags: <defaults>
</compile_context>

<pallas_src>
import numpy as np
import jax
import jax.numpy as jnp
from jax.experimental import pallas as pl
from jax.experimental.pallas import tpu as pltpu


def pool_agg_kernel(x_ref, n_ref, w_ref, b_ref, out_x_ref, out_n_ref):
    """One B-tile of the PoolAggregator forward.

    x_ref     : [TB, F]      bf16  self rows for this node tile
    n_ref     : [TB*K, F]    bf16  node-major neighbor rows (node0's K rows, node1's, ...)
    w_ref     : [F, Hp]      bf16  tran.weight^T, lane-padded to Hp (mult of 128)
    b_ref     : [1, Hp]      f32   tran.bias, lane-padded
    out_x_ref : [TB, Hp]     f32   max over {self} U {neighbors}, transformed
    out_n_ref : [TB, Hp]     f32   max over neighbors only, transformed
    """
    TB, Hp = out_x_ref.shape
    K = n_ref.shape[0] // TB

    w = w_ref[...]                                                       # resident weight tile

    # Two fused MXU matmuls (f32 accumulation): self rows and all K*TB neighbor rows.
    self_t = jnp.dot(x_ref[...], w, preferred_element_type=jnp.float32)  # [TB, Hp]
    nbr_t = jnp.dot(n_ref[...], w, preferred_element_type=jnp.float32)   # [TB*K, Hp]

    # Per-node max over the K neighbors: node-major rows -> sublane reduce (XLU slot).
    nbr_max = jnp.max(nbr_t.reshape(TB, K, Hp), axis=1)                  # [TB, Hp]

    # Bias commutes with the row max -> add it once, after the reductions.
    b = b_ref[...]                                                       # [1, Hp]
    out_n_ref[...] = nbr_max + b
    out_x_ref[...] = jnp.maximum(self_t, nbr_max) + b


def pool_aggregator_forward(x, nbr, w, b, *, tb=8):
    """x: [B, F], nbr: [B, K, F], w: [F, H] (= tran.weight.T), b: [H]
    -> (x_out [B, H], nbr_out [B, H] stacked)."""
    B, F = x.shape
    _, K, _ = nbr.shape
    H = w.shape[1]
    assert K >= 1, "PoolAggregator assumes every node has at least one neighbor"

    # Lane-dense outputs / weights: pad the H (lane) axis to a multiple of 128.
    Hp = ((H + 127) // 128) * 128
    w_p = jnp.pad(w, ((0, 0), (0, Hp - H))).astype(jnp.bfloat16)
    b_p = jnp.pad(b.reshape(1, H), ((0, 0), (0, Hp - H))).astype(jnp.float32)

    # Tile the node axis; pad B up to a multiple of TB (padded rows are sliced off).
    TB = min(tb, B)
    Bp = pl.cdiv(B, TB) * TB
    x_p = jnp.pad(x, ((0, Bp - B), (0, 0))).astype(jnp.bfloat16)
    nbr_p = jnp.pad(nbr, ((0, Bp - B), (0, 0), (0, 0))).astype(jnp.bfloat16)
    # Node-major flatten is contiguous -> free reshape, no extra HBM copy.
    nbr_flat = nbr_p.reshape(Bp * K, F)

    grid = (Bp // TB,)

    out_x, out_n = pl.pallas_call(
        pool_agg_kernel,
        out_shape=(jax.ShapeDtypeStruct((Bp, Hp), jnp.float32),
                   jax.ShapeDtypeStruct((Bp, Hp), jnp.float32)),
        grid=grid,
        in_specs=[
            pl.BlockSpec((TB, F), lambda i: (i, 0)),          # self rows per tile
            pl.BlockSpec((TB * K, F), lambda i: (i, 0)),      # neighbor rows per tile
            pl.BlockSpec((F, Hp), lambda i: (0, 0)),          # weight: resident
            pl.BlockSpec((1, Hp), lambda i: (0, 0)),          # bias: resident
        ],
        out_specs=(pl.BlockSpec((TB, Hp), lambda i: (i, 0)),
                   pl.BlockSpec((TB, Hp), lambda i: (i, 0))),
        compiler_params=pltpu.CompilerParams(
            dimension_semantics=("parallel",),                # megacore-shardable node axis
            vmem_limit_bytes=32 * 1024 * 1024,                # explicit budget (v7x: 64 MiB phys)
        ),
    )(x_p, nbr_flat, w_p, b_p)

    return out_x[:B, :H], out_n[:B, :H]


def pool_aggregator_reference(x, neighbor_list, w, b):
    """Pure-JAX f32 mirror of the PyTorch module.
    x: [B, F]; neighbor_list: list of [K_i, F]; w: [F, H]; b: [H]."""
    f = [jnp.concatenate([x[i:i + 1], n], axis=0) @ w + b
         for i, n in enumerate(neighbor_list)]
    x_out = jnp.concatenate([fi.max(axis=0, keepdims=True) for fi in f], axis=0)
    nbr_out = jnp.concatenate([(n @ w + b).max(axis=0, keepdims=True)
                               for n in neighbor_list], axis=0)
    return x_out, nbr_out


if __name__ == "__main__":
    B, K, F, H = 16, 3, 16, 32   # nodes, neighbors/node, in_features, out_features
    TB = 8                       # node tile -> grid=(2,)

    key = jax.random.PRNGKey(0)
    kx, kn, kw, kb = jax.random.split(key, 4)

    x = jax.random.normal(kx, (B, F), jnp.float32)
    nbr = jax.random.normal(kn, (B, K, F), jnp.float32)

    # Synthetic nn.Linear(F, H, bias=True) parameters (stored transposed: [in, out]).
    w = jax.random.normal(kw, (F, H), jnp.float32) * (1.0 / np.sqrt(F))
    b = jax.random.normal(kb, (H,), jnp.float32) * 0.1

    out_x, out_n = pool_aggregator_forward(x, nbr, w, b, tb=TB)
    out_x, out_n = jax.block_until_ready((out_x, out_n))

    ref_x, ref_n = pool_aggregator_reference(x, [nbr[i] for i in range(B)], w, b)
    # bf16 MXU operands with f32 accumulation: not bit-exact vs f32 reference.
    np.testing.assert_allclose(np.asarray(out_x), np.asarray(ref_x),
                               rtol=2e-2, atol=2e-2)
    np.testing.assert_allclose(np.asarray(out_n), np.asarray(ref_n),
                               rtol=2e-2, atol=2e-2)

    print("KERNEL_OK")
</pallas_src>

<mosaic_0001>
module attributes {stable_mosaic.version = 11 : i64} {
  func.func @pool_agg_kernel(%arg0: i32, %arg1: memref<8x16xbf16, #tpu.memory_space<vmem>>, %arg2: memref<24x16xbf16, #tpu.memory_space<vmem>>, %arg3: memref<16x128xbf16, #tpu.memory_space<vmem>>, %arg4: memref<1x128xf32, #tpu.memory_space<vmem>>, %arg5: memref<8x128xf32, #tpu.memory_space<vmem>>, %arg6: memref<8x128xf32, #tpu.memory_space<vmem>>) attributes {dimension_semantics = [#tpu.dimension_semantics<parallel>], iteration_bounds = array<i64: 2>, scalar_prefetch = 0 : i64, scratch_operands = 0 : i64, tpu.core_type = #tpu.core_type<tc>, window_params = [{transform_indices = @transform_0, window_bounds = array<i64: 8, 16>}, {transform_indices = @transform_1, window_bounds = array<i64: 24, 16>}, {pipeline_mode = #tpu.pipeline_mode<synchronous>, transform_indices = @transform_2, window_bounds = array<i64: 16, 128>}, {pipeline_mode = #tpu.pipeline_mode<synchronous>, transform_indices = @transform_3, window_bounds = array<i64: 1, 128>}, {transform_indices = @transform_4, window_bounds = array<i64: 8, 128>}, {transform_indices = @transform_5, window_bounds = array<i64: 8, 128>}]} {
    %c0 = arith.constant 0 : index
    %c0_0 = arith.constant 0 : index
    %0 = vector.load %arg3[%c0, %c0_0] : memref<16x128xbf16, #tpu.memory_space<vmem>>, vector<16x128xbf16>
    %c0_1 = arith.constant 0 : index
    %c0_2 = arith.constant 0 : index
    %1 = vector.load %arg1[%c0_1, %c0_2] : memref<8x16xbf16, #tpu.memory_space<vmem>>, vector<8x16xbf16>
    %cst = arith.constant dense<0.000000e+00> : vector<8x128xf32>
    %2 = tpu.matmul %1, %0, %cst {dimension_numbers = #tpu.dot_dimension_numbers<[1], [0], [0], [1], [0, 0, 1, 1], [], []>} : vector<8x16xbf16>, vector<16x128xbf16>, vector<8x128xf32> -> vector<8x128xf32>
    %c0_3 = arith.constant 0 : index
    %c0_4 = arith.constant 0 : index
    %3 = vector.load %arg2[%c0_3, %c0_4] : memref<24x16xbf16, #tpu.memory_space<vmem>>, vector<24x16xbf16>
    %cst_5 = arith.constant dense<0.000000e+00> : vector<24x128xf32>
    %4 = tpu.matmul %3, %0, %cst_5 {dimension_numbers = #tpu.dot_dimension_numbers<[1], [0], [0], [1], [0, 0, 1, 1], [], []>} : vector<24x16xbf16>, vector<16x128xbf16>, vector<24x128xf32> -> vector<24x128xf32>
    %5 = vector.shape_cast %4 : vector<24x128xf32> to vector<8x3x128xf32>
    %cst_6 = arith.constant dense<0xFF800000> : vector<8x128xf32>
    %6 = vector.multi_reduction <maximumf>, %5, %cst_6 [1] : vector<8x3x128xf32> to vector<8x128xf32>
    %c0_7 = arith.constant 0 : index
    %c0_8 = arith.constant 0 : index
    %7 = vector.load %arg4[%c0_7, %c0_8] : memref<1x128xf32, #tpu.memory_space<vmem>>, vector<1x128xf32>
    %8 = vector.broadcast %7 : vector<1x128xf32> to vector<8x128xf32>
    %9 = arith.addf %6, %8 : vector<8x128xf32>
    %c0_9 = arith.constant 0 : index
    %c0_10 = arith.constant 0 : index
    %10 = vector.load %arg6[%c0_9, %c0_10] : memref<8x128xf32, #tpu.memory_space<vmem>>, vector<8x128xf32>
    tpu.vector_store %arg6[%c0_9, %c0_10], %9 {strides = array<i32>} : memref<8x128xf32, #tpu.memory_space<vmem>>, vector<8x128xf32>,
    %11 = arith.maximumf %2, %6 : vector<8x128xf32>
    %12 = vector.broadcast %7 : vector<1x128xf32> to vector<8x128xf32>
    %13 = arith.addf %11, %12 : vector<8x128xf32>
    %c0_11 = arith.constant 0 : index
    %c0_12 = arith.constant 0 : index
    %14 = vector.load %arg5[%c0_11, %c0_12] : memref<8x128xf32, #tpu.memory_space<vmem>>, vector<8x128xf32>
    tpu.vector_store %arg5[%c0_11, %c0_12], %13 {strides = array<i32>} : memref<8x128xf32, #tpu.memory_space<vmem>>, vector<8x128xf32>,
    return
  }
  func.func @transform_0(%arg0: i32) -> (i32, i32) {
    %c0_i32 = arith.constant 0 : i32
    %c0_i32_0 = arith.constant 0 : i32
    return %arg0, %c0_i32 : i32, i32
  }
  func.func @transform_1(%arg0: i32) -> (i32, i32) {
    %c0_i32 = arith.constant 0 : i32
    %c0_i32_0 = arith.constant 0 : i32
    return %arg0, %c0_i32 : i32, i32
  }
  func.func @transform_2(%arg0: i32) -> (i32, i32) {
    %c0_i32 = arith.constant 0 : i32
    %c0_i32_0 = arith.constant 0 : i32
    %c0_i32_1 = arith.constant 0 : i32
    return %c0_i32, %c0_i32_0 : i32, i32
  }
  func.func @transform_3(%arg0: i32) -> (i32, i32) {
    %c0_i32 = arith.constant 0 : i32
    %c0_i32_0 = arith.constant 0 : i32
    %c0_i32_1 = arith.constant 0 : i32
    return %c0_i32, %c0_i32_0 : i32, i32
  }
  func.func @transform_4(%arg0: i32) -> (i32, i32) {
    %c0_i32 = arith.constant 0 : i32
    %c0_i32_0 = arith.constant 0 : i32
    return %arg0, %c0_i32 : i32, i32
  }
  func.func @transform_5(%arg0: i32) -> (i32, i32) {
    %c0_i32 = arith.constant 0 : i32
    %c0_i32_0 = arith.constant 0 : i32
    return %arg0, %c0_i32 : i32, i32
  }
}

</mosaic_0001>

<bundles_post_ra>
// kernel: tpu_custom_call.1
= control target key start
LH: loop header
LB: loop body
LE: loop exit
PB: predicated region body
PF: predicated region fallthrough
CT: control target
= control target key end

     0   :  { %11 = vsyncpa [#allocation3], 0  ;;  %s1426_s0 = inlined_call_operand.vmem [shape: bf16[16,16], index: 0, kind: input, shape index: {}]   ;;  %s1427_s1 = inlined_call_operand.vmem [shape: bf16[48,16], index: 1, kind: input, shape index: {}]   ;;  %s1428_s2 = inlined_call_operand.vmem [shape: bf16[16,128], index: 2, kind: input, shape index: {}]   ;;  %s1429_s3 = inlined_call_operand.vmem [shape: f32[1,128], index: 3, kind: input, shape index: {}]   ;;  %s1430_s4 = inlined_call_operand.hbm [shape: f32[16,128], index: 4, kind: output, shape index: {0}]   ;;  %s1431_s5 = inlined_call_operand.hbm [shape: f32[16,128], index: 5, kind: output, shape index: {1}]  }
   0x1   :  { %13 = vsyncpa [#allocation3 + $0x1], 0 }
   0x2   :  { %14 = vsyncpa [#allocation5], 0 }
   0x3   :  { %16 = vsyncpa [#allocation5 + $0x1], 0  ;;  %s1192_s18 = smov 0   ;;  %s1194_s19 = smov 0  }
   0x4   :  { %s1196_s20 = smov 0   ;;  %s1198_s21 = smov 0  }
   0x5 LB: > { %s1213_s22 = sadd.s32 4294967295, %s1155_s21   ;;  %s971_s23 = sadd.s32 4294967294, %s1155_s21   ;;  %s1155_s21 = sphi %s1198_s21, %s1437_s21   ;;  %s1151_s20 = sphi %s1196_s20, %s1436_s20   ;;  %s1147_s19 = sphi %s1194_s19, %s1435_s19   ;;  %s1143_s18 = sphi %s1192_s18, %s1434_s18  }
   0x6   : > { %s1217_s24 = sadd.s32 1, %s1155_s21   ;;  %s123_s25 = sadd.s32 1, %s1151_s20 }
   0x7   : > { %s120_s26 = ssub.s32 %s1155_s21, %s1217_s24  ;;  %p133_p0 = scmp.ne.s32.totalorder %s1151_s20, %s1147_s19 }
   0x8   : > { %p121_p1 = scmp.eq.s32.totalorder %s120_s26, 0  ;;  %p134_p2 = scmp.eq.s32.totalorder %s1213_s22, 1 }
   0x9   : > { %p139_p3 = scmp.ne.s32.totalorder %s1147_s19, %s1143_s18  ;;  %p140_p4 = scmp.eq.s32.totalorder %s971_s23, 1 }
   0xa   : > { %s1228_s27 = scalar_select %p121_p1, %s1151_s20, %s123_s25  }
   0xb   : > { %p1230_p5 = por %p134_p2, %p133_p0  ;;  %p1234_p6 = por %p140_p4, %p139_p3 }
   0xc   : > { %p974_p7 = scmp.ge.s32.totalorder %s1155_s21, 1  ;;  %p206_p8 = scmp.lt.s32.totalorder %s1155_s21, 3 }
   0xe   : > { %p207_p9 = pnand %p974_p7, %p206_p8 }
   0xf   : > { %v1058_v0 = vld [vmem:[%s1428_s2] sm:$0xff] (!%p207_p9)   ;;  %s247_s7 = smul.u32 (!%p207_p9), 3, %s1213_s22  ;;  %p243_p10 = scmp.lt.s32.totalorder (!%p207_p9), %s1213_s22, 1  ;;  %v1157_v1 = vmov (!%p207_p9), 0.0   ;;  %vm1158_vm0 = vmmov (!%p207_p9), 0   ;;  %vm263_vm1 = vcmask (!%p207_p9), 130048   ;;  %v379_v7 = vlaneseq (!%p207_p9) }
  0x10   : > { %210 = sbr.rel (%p207_p9) target bundleno = 326 (0x146), region = 36  ;;  %1005 = vmatprep.subr.bf16.mxu1 (!%p207_p9), %v1058_v0  ;;  %999 = vmatprep.subr.bf16.mxu0 (!%p207_p9), %v1157_v1  ;;  %v1159_v5 = vmov (!%p207_p9), 1966171168   ;;  %vm714_vm2 = vcmask (!%p207_p9), 1042432   ;;  %vm795_vm3 = vcmask (!%p207_p9), 1041409   ;;  %vm798_vm4 = vcmask (!%p207_p9), 1042434  }
  0x11   : > { %p248_p11 = scmp.lt.s32.totalorder (!%p207_p9), %s247_s7, 5  ;;  %1006 = vmatpush3.bf16.msra.mxu1 (!%p207_p9), %v1058_v0  ;;  %1000 = vmatpush3.bf16.msra.mxu0 (!%p207_p9), %v1058_v0  ;;  %v377_v6 = vunpack.c.l.s4 (!%p207_p9), %v1159_v5  ;;  %v380_v9 = vshrl.u32 (!%p207_p9), %v379_v7, 7  ;;  %vm801_vm5 = vcmask (!%p207_p9), 1043459   ;;  %vm804_vm6 = vcmask (!%p207_p9), 1044484   ;;  %s1327_s25 = sand.u32 (!%p207_p9), 1, %s1147_s19  }
  0x12   : > { %1001 = vmatprep.mubr.msk.bf16.mxu0 (!%p207_p9), %vm1158_vm0, %v1157_v1  ;;  %vm807_vm7 = vcmask (!%p207_p9), 1045509   ;;  %s975_s26 = sshll.u32 (!%p207_p9), %s1327_s25, 3  ;;  %vm810_vm8 = vcmask (!%p207_p9), 1046534   ;;  %vm813_vm9 = vcmask (!%p207_p9), 1047559   ;;  %s990_s30 = sshll.u32 (!%p207_p9), %s1213_s22, 7 }
  0x13   : > { %v378_v8 = vunpack.c.0.s8 (!%p207_p9), %v377_v6  ;;  %s235_s6 = scalar_lea.vmem (!%p207_p9), [#allocation2], %s975_s26  ;;  %s1350_s12 = scalar_lea.hbm (!%p207_p9), %s1430_s4, %s990_s30 }
  0x14   : > { %s1361_s14 = scalar_lea.hbm (!%p207_p9), %s1431_s5, %s990_s30  ;;  %s837_s15 = scalar_lea.sflag (!%p207_p9), [#allocation3], %s1327_s25 }
  0x15   : > { %v1254_v11 = vsub.s32 (!%p207_p9), %v378_v8, %v380_v9  ;;  %s1160_s17 = smov (!%p207_p9), [#allocation2]  }
  0x16   : > { %s1065_s23 = sshll.u32 (!%p207_p9), %s1160_s17, 4  ;;  %s1066_s23 = int_to_ptr.vmem [resolvable:$false] %s1065_s23 }
  0x17   : > { %s244_s8 = scalar_select %p243_p10, %s1213_s22, 1 }
  0x18   : > { %s1439_s7 = smov (!%p248_p11, %s247_s7), 5 }
  0x19   : > { %s977_s9 = sshll.u32 %s244_s8, 2  ;;  %s978_s10 = sshll.u32 %s1439_s7, 2 }
  0x1a   : > { %s246_s13 = scalar_lea.vmem %s1426_s0, %s977_s9  ;;  %s251_s16 = scalar_lea.vmem %s1427_s1, %s978_s10 }
  0x1b   : > { %v256_v2 = vld [vmem:[%s246_s13] sm:$0xf]  ;;  %v1060_v4 = vld [vmem:[%s251_s16 + $0x8] ss:$0 sps:$4 sm:$0xff]   ;;  %s855_s7 = sshll.u32 %s235_s6, 4  ;;  %s242_s8 = scalar_lea.vmem [#allocation4], %s975_s26  ;;  %s1354_s7 = int_to_ptr.vmem [resolvable:$true] %s855_s7 }
  0x1c   : > { %1002 = vmatmul.mubr.msk.bf16.vlgmr.msra.gmra.mrb[0].mxu0 %vm263_vm1, %v256_v2  ;;  %v1059_v3 = vld [vmem:[%s251_s16] sm:$0xff]   ;;  %s868_s9 = sshll.u32 %s242_s8, 4  ;;  %s1061_s16 = scalar_lea.vmem %s1354_s7, 128  ;;  %s1363_s9 = int_to_ptr.vmem [resolvable:$true] %s868_s9 }
  0x1d   : > { %1007 = vmatprep.mubr.msk.bf16.mxu1 %vm263_vm1, %v1059_v3  ;;  %p1062_p12 = scmp.ne.s32.totalorder %s1354_s7, %s1061_s16  ;;  %s1067_s26 = scalar_lea.vmem %s1066_s23, 256 }
  0x1e   : > { %1008 = vmatmul.mubr.msk.bf16.vlgmr.msra.gmra.mrb[0].mxu1 %vm263_vm1, %v1060_v4  ;;  %p1068_p1 = scmp.lt.s32.totalorder %s1354_s7, %s1066_s23  ;;  %p1069_p2 = scmp.lt.s32.totalorder %s1067_s26, %s1061_s16 }
  0x1f   : > { %p1063_p13 = pnand %p1062_p12, %p1230_p5 }
  0x20   : > { %p1070_p3 = por %p1069_p2, %p1068_p1 }
  0x21   : > { %p1064_p0 = pneg %p1063_p13 }
  0x23   : > { %p1071_p4 = pnand %p1070_p3, %p1064_p0 }
  0xef   : > { %v1252_v10 = vpop.f32.mrb[0].mxu0 }
  0xf0   : > { %v1003_v12 = vpop.f32.mrb[1].mxu0 }
  0xf1   : > { %v304_v13 = vpop.f32.mrb[2].mxu0  ;;  %v1009_v15 = vpop.f32.mrb[0].mxu1 }
  0xf2   : > { %v1004_v14 = vpop.f32.mrb[3].mxu0  ;;  %v473_v16 = vcombine.high %v1009_v15, %v1009_v15  ;;  %v480_v17 = vrot.slane %v1009_v15, %v1254_v11  ;;  %v358_v18 = vpop.f32.mrb[1].mxu1 }
  0xf3   : > { %v375_v19 = vcombine.high %v358_v18, %v358_v18  ;;  %v382_v20 = vrot.slane %v358_v18, %v1254_v11  ;;  %v1010_v21 = vpop.f32.mrb[2].mxu1 }
  0xf4   : > { %v487_v22 = vrot.slane %v473_v16, %v1254_v11  ;;  %v488_v23 = vcombine.high %v480_v17, %v480_v17  ;;  %v1260_v24 = vrot.slane %v480_v17, %v1254_v11  ;;  %v361_v25 = vpop.f32.mrb[3].mxu1 }
  0xf5   : > { %v389_v26 = vrot.slane %v375_v19, %v1254_v11  ;;  %v390_v27 = vcombine.high %v382_v20, %v382_v20  ;;  %v398_v28 = vrot.slane %v382_v20, %v1254_v11  ;;  %v424_v29 = vcombine.high %v361_v25, %v361_v25 }
  0xf6   : > { %v489_v30 = vcombine.high %v487_v22, %v487_v22  ;;  %v503_v31 = vrot.slane %v487_v22, %v1254_v11  ;;  %v1266_v32 = vrot.slane %v488_v23, %v1254_v11  ;;  %v431_v33 = vrot.slane %v361_v25, %v1254_v11 }
  0xf7   : > { %v391_v34 = vcombine.high %v389_v26, %v389_v26  ;;  %v405_v35 = vrot.slane %v389_v26, %v1254_v11  ;;  %v412_v36 = vrot.slane %v390_v27, %v1254_v11  ;;  %v420_v37 = vcombine.high %v398_v28, %v398_v28 }
  0xf8   : > { %v517_v38 = vrot.slane %v489_v30, %v1254_v11  ;;  %v519_v39 = vcombine.high %v503_v31, %v503_v31  ;;  %v651_v40 = vrot.slane %v1266_v32, %v1254_v11  ;;  %v986_v41 = vcombine.high %v1260_v24, %v1266_v32 }
  0xf9   : > { %v674_v42 = vrot.slane %v503_v31, %v1254_v11  ;;  %v419_v43 = vrot.slane %v391_v34, %v1254_v11  ;;  %v422_v44 = vcombine.high %v412_v36, %v412_v36  ;;  %v522_v45 = vcombine.low %v398_v28, %v412_v36 }
  0xfa   : > { %v521_v46 = vcombine.high %v517_v38, %v517_v38  ;;  %v667_v47 = vrot.slane %v986_v41, %v1254_v11  ;;  %v683_v48 = vcombine.low %v517_v38, %v519_v39  ;;  %v536_v49 = vrot.slane %v420_v37, %v1254_v11 }
  0xfb   : > { %v529_v50 = vrot.slane %v522_v45, %v1254_v11  ;;  %v545_v51 = vcombine.low %v422_v44, %v405_v35  ;;  %v559_v52 = vrot.slane %v419_v43, %v1254_v11  ;;  %v985_v53 = vcombine.high %v405_v35, %v419_v43 }
  0xfc   : > { %v675_v54 = vcombine.low %v667_v47, %v674_v42  ;;  %v690_v55 = vrot.slane %v683_v48, %v1254_v11  ;;  %v697_v56 = vrot.slane %v521_v46, %v1254_v11  ;;  %v438_v57 = vrot.slane %v424_v29, %v1254_v11 }
  0xfd   : > { %v537_v58 = vcombine.low %v529_v50, %v536_v49  ;;  %v552_v59 = vrot.slane %v545_v51, %v1254_v11  ;;  %v439_v60 = vcombine.high %v431_v33, %v431_v33  ;;  %v447_v61 = vrot.slane %v431_v33, %v1254_v11 }
  0xfe   : > { %v682_v62 = vrot.slane %v675_v54, %v1254_v11  ;;  %v698_v63 = vcombine.low %v690_v55, %v697_v56  ;;  %v440_v0 = vcombine.high %v438_v57, %v438_v57  ;;  %v454_v1 = vrot.slane %v438_v57, %v1254_v11 }
  0xff   : > { %v544_v2 = vrot.slane %v537_v58, %v1254_v11  ;;  %v560_v3 = vcombine.low %v552_v59, %v559_v52  ;;  %v461_v4 = vrot.slane %v439_v60, %v1254_v11  ;;  %v469_v5 = vcombine.high %v447_v61, %v447_v61 }
 0x100   : > { %v468_v6 = vrot.slane %v440_v0, %v1254_v11  ;;  %v470_v7 = vcombine.high %v454_v1, %v454_v1  ;;  %v575_v8 = vrot.slane %v985_v53, %v1254_v11  ;;  %v582_v9 = vrot.slane %v447_v61, %v1254_v11 }
 0x101   : > { %v567_v12 = vrot.slane %v560_v3, %v1254_v11  ;;  %v715_v13 = vsel %vm714_vm2, %v544_v2, -inf  ;;  %v471_v14 = vcombine.high %v461_v4, %v461_v4  ;;  %v591_v15 = vcombine.low %v461_v4, %v469_v5 }
 0x102   : > { %v716_v16 = vrot.slane %v715_v13, 4  ;;  %v472_v17 = vcombine.high %v468_v6, %v468_v6  ;;  %v583_v18 = vcombine.low %v575_v8, %v582_v9  ;;  %v614_v19 = vcombine.low %v454_v1, %v468_v6 }
 0x103   : > { %v722_v20 = vsel %vm714_vm2, %v567_v12, -inf  ;;  %v598_v21 = vrot.slane %v591_v15, %v1254_v11  ;;  %v605_v22 = vrot.slane %v471_v14, %v1254_v11  ;;  %v628_v23 = vrot.slane %v470_v7, %v1254_v11 }
 0x104   : > { %v717_v25 = vmax.f32 %v715_v13, %v716_v16  ;;  %v723_v26 = vrot.slane %v722_v20, 4  ;;  %v590_v27 = vrot.slane %v583_v18, %v1254_v11  ;;  %v621_v28 = vrot.slane %v614_v19, %v1254_v11 }
 0x105   : > { %v606_v29 = vcombine.low %v598_v21, %v605_v22  ;;  %v637_v30 = vcombine.low %v472_v17, %v1260_v24  ;;  %v705_v31 = vrot.slane %v698_v63, %v1254_v11  ;;  %v757_v33 = vsel %vm714_vm2, %v682_v62, -inf }
 0x106   : > { %v718_v34 = vrot.slane %v717_v25, 2  ;;  %v724_v35 = vmax.f32 %v722_v20, %v723_v26  ;;  %v629_v36 = vcombine.low %v621_v28, %v628_v23  ;;  %v729_v37 = vsel %vm714_vm2, %v590_v27, -inf }
 0x107   : > { %v613_v38 = vrot.slane %v606_v29, %v1254_v11  ;;  %v644_v39 = vrot.slane %v637_v30, %v1254_v11  ;;  %v730_v41 = vrot.slane %v729_v37, 4  ;;  %v758_v42 = vrot.slane %v757_v33, 4 }
 0x108   : > { %v719_v43 = vmax.f32 %v717_v25, %v718_v34  ;;  %v725_v44 = vrot.slane %v724_v35, 2  ;;  %v636_v24 = vrot.slane %v629_v36, %v1254_v11  ;;  %v764_v45 = vsel %vm714_vm2, %v705_v31, -inf }
 0x109   : > { %v652_v46 = vcombine.low %v644_v39, %v651_v40  ;;  %v731_v47 = vmax.f32 %v729_v37, %v730_v41  ;;  %v736_v48 = vsel %vm714_vm2, %v613_v38, -inf  ;;  %v759_v49 = vmax.f32 %v757_v33, %v758_v42 }
 0x10a   : > { %v720_v50 = vrot.slane %v719_v43, 1  ;;  %v726_v51 = vmax.f32 %v724_v35, %v725_v44  ;;  %v737_v52 = vrot.slane %v736_v48, 4  ;;  %v743_v53 = vsel %vm714_vm2, %v636_v24, -inf }
 0x10b   : > { %v659_v54 = vrot.slane %v652_v46, %v1254_v11  ;;  %v732_v55 = vrot.slane %v731_v47, 2  ;;  %v744_v56 = vrot.slane %v743_v53, 4  ;;  %v760_v57 = vrot.slane %v759_v49, 2  ;;  %v1320_v11 = vld [vmem:[%s1429_s3] ss:$0 sm:$0xff] }
 0x10c   : > { %v727_v58 = vrot.slane %v726_v51, 1  ;;  %v738_v59 = vmax.f32 %v736_v48, %v737_v52  ;;  %v765_v60 = vrot.slane %v764_v45, 4  ;;  %v721_v63 = vmax.f32 %v719_v43, %v720_v50 }
 0x10d   : > { %v733_v32 = vmax.f32 %v731_v47, %v732_v55  ;;  %v745_v40 = vmax.f32 %v743_v53, %v744_v56  ;;  %v750_v61 = vsel %vm714_vm2, %v659_v54, -inf  ;;  %v761_v62 = vmax.f32 %v759_v49, %v760_v57 }
 0x10e   : > { %v739_v0 = vrot.slane %v738_v59, 2  ;;  %v728_v1 = vmax.f32 %v726_v51, %v727_v58  ;;  %v751_v2 = vrot.slane %v750_v61, 4  ;;  %v766_v5 = vmax.f32 %v764_v45, %v765_v60 }
 0x10f   : > { %v734_v3 = vrot.slane %v733_v32, 1  ;;  %v746_v4 = vrot.slane %v745_v40, 2  ;;  %v762_v8 = vrot.slane %v761_v62, 1  ;;  %v778_v16 = vadd.f32 %v1320_v11, %v721_v63 }
 0x110   : > { %v740_v6 = vmax.f32 %v738_v59, %v739_v0  ;;  %v752_v7 = vmax.f32 %v750_v61, %v751_v2  ;;  %v779_v9 = vadd.f32 %v1320_v11, %v728_v1  ;;  %v767_v14 = vrot.slane %v766_v5, 2 }
 0x111   : > { %v735_v12 = vmax.f32 %v733_v32, %v734_v3  ;;  %v747_v13 = vmax.f32 %v745_v40, %v746_v4  ;;  %v825_v15 = vsel %vm795_vm3, %v728_v1, %v721_v63  ;;  %v763_v30 = vmax.f32 %v761_v62, %v762_v8 }
 0x112   : > { %v741_v17 = vrot.slane %v740_v6, 1  ;;  %v753_v18 = vrot.slane %v752_v7, 2  ;;  %v794_v19 = vrot.slane %v779_v9, 7  ;;  %v768_v22 = vmax.f32 %v766_v5, %v767_v14 }
 0x113   : > { %v780_v20 = vadd.f32 %v1320_v11, %v735_v12  ;;  %v748_v21 = vrot.slane %v747_v13, 1  ;;  %v826_v26 = vsel %vm798_vm4, %v735_v12, %v825_v15  ;;  %v784_v43 = vadd.f32 %v1320_v11, %v763_v30 }
 0x114   : > { %v742_v23 = vmax.f32 %v740_v6, %v741_v17  ;;  %v754_v25 = vmax.f32 %v752_v7, %v753_v18  ;;  %v796_v27 = vsel %vm795_vm3, %v794_v19, %v778_v16  ;;  %v769_v31 = vrot.slane %v768_v22, 1 }
 0x115   : > { %v797_v28 = vrot.slane %v780_v20, 6  ;;  %v749_v29 = vmax.f32 %v747_v13, %v748_v21  ;;  %v809_v52 = vrot.slane %v784_v43, 2 }
 0x116   : > { %v755_v33 = vrot.slane %v754_v25, 1  ;;  %v781_v34 = vadd.f32 %v1320_v11, %v742_v23  ;;  %v827_v35 = vsel %vm801_vm5, %v742_v23, %v826_v26  ;;  %v770_v36 = vmax.f32 %v768_v22, %v769_v31 }
 0x117   : > { %v782_v37 = vadd.f32 %v1320_v11, %v749_v29  ;;  %v828_v38 = vsel %vm804_vm6, %v749_v29, %v827_v35  ;;  %v799_v39 = vsel %vm798_vm4, %v797_v28, %v796_v27 }
 0x118   : > { %v756_v41 = vmax.f32 %v754_v25, %v755_v33  ;;  %v800_v42 = vrot.slane %v781_v34, 5  ;;  %v785_v45 = vadd.f32 %v1320_v11, %v770_v36 }
 0x119   : > { %v803_v44 = vrot.slane %v782_v37, 4 }
 0x11a   : > { %v783_v24 = vadd.f32 %v1320_v11, %v756_v41  ;;  %v829_v46 = vsel %vm807_vm7, %v756_v41, %v828_v38  ;;  %v802_v47 = vsel %vm801_vm5, %v800_v42, %v799_v39  ;;  %v812_v54 = vrot.slane %v785_v45, 1 }
 0x11b   : > { %v830_v48 = vsel %vm810_vm8, %v763_v30, %v829_v46  ;;  %v805_v49 = vsel %vm804_vm6, %v803_v44, %v802_v47 }
 0x11c   : > { %v806_v50 = vrot.slane %v783_v24, 3  ;;  %v831_v51 = vsel %vm813_vm9, %v770_v36, %v830_v48 }
 0x11d   : > { %v833_v53 = vmax.f32 %v1252_v10, %v831_v51 }
 0x11e   : > { %v808_v55 = vsel %vm807_vm7, %v806_v50, %v805_v49 }
 0x11f   : > { %v834_v56 = vadd.f32 %v1320_v11, %v833_v53  ;;  %v811_v10 = vsel %vm810_vm8, %v809_v52, %v808_v55 }
 0x120   : > { %v814_v57 = vsel %vm813_vm9, %v812_v54, %v811_v10 }
 0x121   : > { %835 = vst [vmem:[%s235_s6] sm:$0xff] %v834_v56  ;;  %816 = vst [vmem:[%s242_s8] sm:$0xff] %v814_v57 }
 0x122   : > { %1074 = shalt.err (!%p1071_p4)
}
 0x123   : > { %s1075_s30 = scalar_lea.hbm %s1350_s12, 128  ;;  %s1079_s10 = scalar_lea.hbm %s1430_s4, 256 }
 0x124   : > { %p1076_p7 = scmp.ne.s32.totalorder %s1350_s12, %s1075_s30  ;;  %p1080_p10 = scmp.lt.u32.totalorder %s1350_s12, %s1430_s4 }
 0x125   : > { %p1081_p11 = scmp.lt.u32.totalorder %s1079_s10, %s1075_s30  ;;  %p1083_p13 = scmp.lt.u32.totalorder %s1075_s30, %s1350_s12 }
 0x126   : > { %p1077_p8 = pnand %p1076_p7, %p1230_p5 }
 0x127   : > { %p1082_p12 = por %p1081_p11, %p1080_p10 }
 0x128   : > { %p1078_p9 = pneg %p1077_p8 }
 0x129   : > { %p1084_p0 = por %p1083_p13, %p1082_p12 }
 0x12b   : > { %p1085_p1 = pnand %p1084_p0, %p1078_p9 }
 0x12d   : > { %1088 = shalt.err (!%p1085_p1)
}
 0x12e   : > { %1011 = dma.vmem_to_hbm [thread:$0]  (%p1230_p5), %s1354_s7, 128, %s1350_s12, %s837_s15  }
 0x12f   : > { %s842_s13 = scalar_lea.sflag [#allocation5], %s1327_s25  ;;  %s1089_s16 = scalar_lea.vmem %s1363_s9, 128 }
 0x130   : > { %p1090_p2 = scmp.ne.s32.totalorder %s1363_s9, %s1089_s16  ;;  %s1161_s17 = smov [#allocation4]  }
 0x131   : > { %s1093_s23 = sshll.u32 %s1161_s17, 4  ;;  %s1094_s23 = int_to_ptr.vmem [resolvable:$false] %s1093_s23 }
 0x132   : > { %p1091_p3 = pnand %p1090_p2, %p1230_p5  ;;  %s1095_s26 = scalar_lea.vmem %s1094_s23, 256 }
 0x133   : > { %p1096_p7 = scmp.lt.s32.totalorder %s1363_s9, %s1094_s23  ;;  %p1097_p8 = scmp.lt.s32.totalorder %s1095_s26, %s1089_s16 }
 0x134   : > { %p1092_p4 = pneg %p1091_p3 }
 0x135   : > { %p1098_p9 = por %p1097_p8, %p1096_p7 }
 0x137   : > { %p1099_p10 = pnand %p1098_p9, %p1092_p4 }
 0x139   : > { %1102 = shalt.err (!%p1099_p10)
}
 0x13a   : > { %s1103_s25 = scalar_lea.hbm %s1361_s14, 128  ;;  %s1107_s15 = scalar_lea.hbm %s1431_s5, 256 }
 0x13b   : > { %p1104_p11 = scmp.ne.s32.totalorder %s1361_s14, %s1103_s25  ;;  %p1108_p0 = scmp.lt.u32.totalorder %s1361_s14, %s1431_s5 }
 0x13c   : > { %p1109_p1 = scmp.lt.u32.totalorder %s1107_s15, %s1103_s25  ;;  %p1111_p3 = scmp.lt.u32.totalorder %s1103_s25, %s1361_s14 }
 0x13d   : > { %p1105_p12 = pnand %p1104_p11, %p1230_p5 }
 0x13e   : > { %p1110_p2 = por %p1109_p1, %p1108_p0 }
 0x13f   : > { %p1106_p13 = pneg %p1105_p12 }
 0x140   : > { %p1112_p4 = por %p1111_p3, %p1110_p2 }
 0x142   : > { %p1113_p7 = pnand %p1112_p4, %p1106_p13 }
 0x144   : > { %1116 = shalt.err (!%p1113_p7)
}
 0x145   : > { %1012 = dma.vmem_to_hbm [thread:$0]  (%p1230_p5), %s1363_s9, 128, %s1361_s14, %s842_s13  }
 0x146 PF: > { %p1022_p8 = scmp.ge.s32.totalorder %s1155_s21, 2  ;;  %s880_s8 = sand.u32 1, %s1143_s18  }
 0x147   : > { %s881_s10 = scalar_lea.sflag [#allocation3], %s880_s8 }
 0x148   : > { %p1016_p9 = pnand %p1022_p8, %p1234_p6 }
 0x14a   : > { %1134 = dma.done.wait (!%p1016_p9), %s881_s10, 128  }
 0x14b   : > { %1136 = vsyncadd (!%p1016_p9), %s881_s10, 4294967168  ;;  %s890_s11 = scalar_lea.sflag [#allocation5], %s880_s8 }
 0x14c   : > { %1138 = dma.done.wait (!%p1016_p9), %s890_s11, 128  }
 0x14d   : > { %1140 = vsyncadd (!%p1016_p9), %s890_s11, 4294967168  ;;  %p19_p5 = scmp.ge.s32.totalorder %s1217_s24, 4   ;;  %s1434_s18 = smov %s1147_s19 }
 0x14e   : > { %s1435_s19 = smov %s1151_s20  ;;  %s1436_s20 = smov %s1228_s27 }
 0x14f   : > { %s1437_s21 = smov %s1217_s24  ;;  %21 = sbr.rel (!%p19_p5) target bundleno = 5 (0x5), region = 91 }
 0x156   :  { %895 = vsyncpa [#allocation3], 1 }
 0x157   :  { %897 = vsyncpa [#allocation3 + $0x1], 1 }
 0x158   :  { %898 = vsyncpa [#allocation5], 1 }
 0x159   :  { %900 = vsyncpa [#allocation5 + $0x1], 1 }

</bundles_post_ra>
